<compile_context>
chip_gen: v7x
topology: tpu7x:2x2x1
jax: 0.10.0
libtpu: 0.0.40
codegen_flags: <defaults>
</compile_context>

<pallas_src>
import math

import jax
import jax.numpy as jnp
from jax import lax
from jax.experimental import pallas as pl
from jax.experimental.pallas import tpu as pltpu

# ---------------- problem sizes (small, consistent with the module) ----------------
B = 2        # batch
S = 8        # sequence length
D = 32       # embed_dim
H = 4        # n_heads
DH = D // H  # per-head dim
DPF = 64     # d_pf
G = B * H    # combined (batch, head) dim used for batched attention
LN_EPS = 1e-5


def _encoder_kernel(x_ref, wqkv_ref, bqkv_ref, wo_ref, ffw_ref, b1_ref, vec_ref,
                    out_ref, scores_ref):
    """Single invocation: whole batch processed at once, everything resident in VMEM."""
    x = x_ref[...].astype(jnp.float32)                     # (B, S, D)

    vec = vec_ref[...]                                     # (6, D) packed bias/LN vectors
    bo, g1, be1, b2, g2, be2 = (vec[0:1], vec[1:2], vec[2:3],
                                vec[3:4], vec[4:5], vec[5:6])

    # ---- replicate activations per head / weights per batch (leading-dim ops only) ----
    x_bh = jnp.broadcast_to(x[:, None], (B, H, S, D)).reshape(G, S, D)          # (G, S, D)
    wqkv = jnp.broadcast_to(wqkv_ref[...][None],
                            (B, H, D, 3 * DH)).reshape(G, D, 3 * DH)            # (G, D, 3DH)
    bqkv = jnp.broadcast_to(bqkv_ref[...][None],
                            (B, H, 1, 3 * DH)).reshape(G, 1, 3 * DH)            # (G, 1, 3DH)
    wo = jnp.broadcast_to(wo_ref[...][None], (B, H, DH, D)).reshape(G, DH, D)   # (G, DH, D)

    # ---- fused QKV projection, batched over the combined (batch*head) dim ----
    qkv = jnp.einsum('gsd,gde->gse', x_bh, wqkv,
                     preferred_element_type=jnp.float32) + bqkv                 # (G, S, 3DH)
    q = qkv[:, :, 0:DH]
    k = qkv[:, :, DH:2 * DH]
    v = qkv[:, :, 2 * DH:3 * DH]

    # ---- scaled dot-product attention (one batched dot_general, no per-head loop) ----
    scale = 1.0 / math.sqrt(DH)
    s = jnp.einsum('gqd,gkd->gqk', q, k, preferred_element_type=jnp.float32) * scale  # (G,S,S)
    s = s - jnp.max(s, axis=-1, keepdims=True)
    p = jnp.exp(s)
    p = p * pl.reciprocal(jnp.sum(p, axis=-1, keepdims=True), approx=True)
    scores_ref[...] = p.astype(scores_ref.dtype)           # (G, S, S) -> reshaped in wrapper

    ctx = jnp.einsum('gqk,gkd->gqd', p, v, preferred_element_type=jnp.float32)  # (G, S, DH)

    # ---- output projection: per-head projection then sum over heads == concat(heads) @ Wo ----
    proj = jnp.einsum('gsd,gde->gse', ctx, wo,
                      preferred_element_type=jnp.float32)                       # (G, S, D)
    attn = jnp.sum(proj.reshape(B, H, S, D), axis=1) + bo                       # (B, S, D)

    # ---- residual + LayerNorm 1 ----
    y = x + attn
    mu = jnp.mean(y, axis=-1, keepdims=True)
    var = jnp.mean((y - mu) * (y - mu), axis=-1, keepdims=True)
    y = (y - mu) * lax.rsqrt(var + LN_EPS) * g1 + be1

    # ---- position-wise feed-forward (weights broadcast over B, batched dots) ----
    w1b = jnp.broadcast_to(ffw_ref[0], (B, D, DPF))         # W1    (D, DPF)
    w2tb = jnp.broadcast_to(ffw_ref[1], (B, D, DPF))        # W2^T  (D, DPF)
    h1 = jnp.einsum('bsd,bdf->bsf', y, w1b,
                    preferred_element_type=jnp.float32) + b1_ref[...]
    h1 = jnp.maximum(h1, 0.0)
    f = jnp.einsum('bsf,bdf->bsd', h1, w2tb,
                   preferred_element_type=jnp.float32) + b2

    # ---- residual + LayerNorm 2 ----
    z = y + f
    mu2 = jnp.mean(z, axis=-1, keepdims=True)
    var2 = jnp.mean((z - mu2) * (z - mu2), axis=-1, keepdims=True)
    z = (z - mu2) * lax.rsqrt(var2 + LN_EPS) * g2 + be2

    out_ref[...] = z.astype(out_ref.dtype)


def encoder_layer_pallas(x, params):
    """x: (B, S, D) float32.  Returns (out (B,S,D), scores (B,H,S,S))."""
    (wq, bq, wk, bk, wv, bv, wo, bo, g1, be1, w1, b1, w2, b2, g2, be2) = params

    # ---- pack parameters in the wrapper (free in XLA) ----
    def head_cols(w):                      # (D, D) -> (H, D, DH): columns of head h
        return w.reshape(D, H, DH).transpose(1, 0, 2)

    def head_bias(b_):                     # (1, D) -> (H, 1, DH)
        return b_.reshape(H, 1, DH)

    wqkv_h = jnp.concatenate([head_cols(wq), head_cols(wk), head_cols(wv)], axis=-1)  # (H,D,3DH)
    bqkv_h = jnp.concatenate([head_bias(bq), head_bias(bk), head_bias(bv)], axis=-1)  # (H,1,3DH)
    wo_h = wo.reshape(H, DH, D)                                                        # (H,DH,D)

    ffw = jnp.stack([w1, w2.T])                                     # (2, D, DPF)
    vec = jnp.concatenate([bo, g1, be1, b2, g2, be2], axis=0)       # (6, D)

    def full(shape):
        return pl.BlockSpec(shape, lambda i: (0,) * len(shape))

    out_shape = (
        jax.ShapeDtypeStruct((B, S, D), jnp.float32),
        jax.ShapeDtypeStruct((G, S, S), jnp.float32),
    )

    out, scores = pl.pallas_call(
        _encoder_kernel,
        out_shape=out_shape,
        grid_spec=pltpu.PrefetchScalarGridSpec(
            num_scalar_prefetch=0,
            grid=(1,),
            in_specs=[
                full((B, S, D)),            # x
                full((H, D, 3 * DH)),       # fused per-head QKV weight
                full((H, 1, 3 * DH)),       # fused per-head QKV bias
                full((H, DH, D)),           # per-head Wo slices
                full((2, D, DPF)),          # [W1, W2^T]
                full((1, DPF)),             # b1
                full((6, D)),               # [bo, g1, be1, b2, g2, be2]
            ],
            out_specs=(full((B, S, D)), full((G, S, S))),
        ),
        compiler_params=pltpu.CompilerParams(dimension_semantics=("arbitrary",)),
    )(x, wqkv_h, bqkv_h, wo_h, ffw, b1, vec)

    return out, scores.reshape(B, H, S, S)


def encoder_layer_ref(x, params):
    """Pure-JAX reference with identical semantics (for validation)."""
    (wq, bq, wk, bk, wv, bv, wo, bo, g1, be1, w1, b1, w2, b2, g2, be2) = params
    q = x @ wq + bq
    k = x @ wk + bk
    v = x @ wv + bv

    def split(t):  # (B,S,D) -> (B,H,S,DH)
        return t.reshape(B, S, H, DH).transpose(0, 2, 1, 3)

    qh, kh, vh = split(q), split(k), split(v)
    s = jnp.einsum("bhqd,bhkd->bhqk", qh, kh) / math.sqrt(DH)
    p = jax.nn.softmax(s, axis=-1)
    o = jnp.einsum("bhqk,bhkd->bhqd", p, vh).transpose(0, 2, 1, 3).reshape(B, S, D)
    o = o @ wo + bo

    def ln(t, g, b):
        mu = t.mean(-1, keepdims=True)
        var = ((t - mu) ** 2).mean(-1, keepdims=True)
        return (t - mu) * lax.rsqrt(var + LN_EPS) * g + b

    y = ln(x + o, g1, be1)
    f = jnp.maximum(y @ w1 + b1, 0.0) @ w2 + b2
    z = ln(y + f, g2, be2)
    return z, p


def make_params(key):
    ks = jax.random.split(key, 8)
    sc = 0.05
    wq = sc * jax.random.normal(ks[0], (D, D), jnp.float32)
    wk = sc * jax.random.normal(ks[1], (D, D), jnp.float32)
    wv = sc * jax.random.normal(ks[2], (D, D), jnp.float32)
    wo = sc * jax.random.normal(ks[3], (D, D), jnp.float32)
    w1 = sc * jax.random.normal(ks[4], (D, DPF), jnp.float32)
    w2 = sc * jax.random.normal(ks[5], (DPF, D), jnp.float32)
    bq = 0.01 * jnp.ones((1, D), jnp.float32)
    bk = -0.01 * jnp.ones((1, D), jnp.float32)
    bv = 0.02 * jnp.ones((1, D), jnp.float32)
    bo = jnp.zeros((1, D), jnp.float32)
    b1 = 0.01 * jnp.ones((1, DPF), jnp.float32)
    b2 = jnp.zeros((1, D), jnp.float32)
    g1 = jnp.ones((1, D), jnp.float32)
    be1 = jnp.zeros((1, D), jnp.float32)
    g2 = jnp.ones((1, D), jnp.float32)
    be2 = jnp.zeros((1, D), jnp.float32)
    return (wq, bq, wk, bk, wv, bv, wo, bo, g1, be1, w1, b1, w2, b2, g2, be2)


if __name__ == "__main__":
    key = jax.random.PRNGKey(0)
    kx, kp = jax.random.split(key)
    x = jax.random.normal(kx, (B, S, D), jnp.float32)
    params = make_params(kp)

    out, scores = jax.jit(encoder_layer_pallas)(x, params)
    jax.block_until_ready((out, scores))

    out_ref, scores_ref = encoder_layer_ref(x, params)
    assert out.shape == (B, S, D) and scores.shape == (B, H, S, S)
    # tolerance 2e-3: approx=True softmax reciprocal (EUP vrcp) trades ~1e-4-level accuracy for speed
    assert jnp.allclose(out, out_ref, atol=2e-3, rtol=2e-3)
    assert jnp.allclose(scores, scores_ref, atol=2e-3, rtol=2e-3)

    print("KERNEL_OK")
</pallas_src>

<mosaic_0001>
module attributes {stable_mosaic.version = 11 : i64} {
  func.func @_encoder_kernel(%arg0: i32, %arg1: memref<2x8x32xf32, #tpu.memory_space<vmem>>, %arg2: memref<4x32x24xf32, #tpu.memory_space<vmem>>, %arg3: memref<4x1x24xf32, #tpu.memory_space<vmem>>, %arg4: memref<4x8x32xf32, #tpu.memory_space<vmem>>, %arg5: memref<2x32x64xf32, #tpu.memory_space<vmem>>, %arg6: memref<1x64xf32, #tpu.memory_space<vmem>>, %arg7: memref<6x32xf32, #tpu.memory_space<vmem>>, %arg8: memref<2x8x32xf32, #tpu.memory_space<vmem>>, %arg9: memref<8x8x8xf32, #tpu.memory_space<vmem>>) attributes {dimension_semantics = [#tpu.dimension_semantics<arbitrary>], iteration_bounds = array<i64: 1>, scalar_prefetch = 0 : i64, scratch_operands = 0 : i64, tpu.core_type = #tpu.core_type<tc>, window_params = [{pipeline_mode = #tpu.pipeline_mode<synchronous>, transform_indices = @transform_0, window_bounds = array<i64: 2, 8, 32>}, {pipeline_mode = #tpu.pipeline_mode<synchronous>, transform_indices = @transform_1, window_bounds = array<i64: 4, 32, 24>}, {pipeline_mode = #tpu.pipeline_mode<synchronous>, transform_indices = @transform_2, window_bounds = array<i64: 4, 1, 24>}, {pipeline_mode = #tpu.pipeline_mode<synchronous>, transform_indices = @transform_3, window_bounds = array<i64: 4, 8, 32>}, {pipeline_mode = #tpu.pipeline_mode<synchronous>, transform_indices = @transform_4, window_bounds = array<i64: 2, 32, 64>}, {pipeline_mode = #tpu.pipeline_mode<synchronous>, transform_indices = @transform_5, window_bounds = array<i64: 1, 64>}, {pipeline_mode = #tpu.pipeline_mode<synchronous>, transform_indices = @transform_6, window_bounds = array<i64: 6, 32>}, {pipeline_mode = #tpu.pipeline_mode<synchronous>, transform_indices = @transform_7, window_bounds = array<i64: 2, 8, 32>}, {pipeline_mode = #tpu.pipeline_mode<synchronous>, transform_indices = @transform_8, window_bounds = array<i64: 8, 8, 8>}]} {
    %c0 = arith.constant 0 : index
    %c0_0 = arith.constant 0 : index
    %c0_1 = arith.constant 0 : index
    %0 = vector.load %arg1[%c0, %c0_0, %c0_1] : memref<2x8x32xf32, #tpu.memory_space<vmem>>, vector<2x8x32xf32>
    %c0_2 = arith.constant 0 : index
    %c0_3 = arith.constant 0 : index
    %1 = vector.load %arg7[%c0_2, %c0_3] : memref<6x32xf32, #tpu.memory_space<vmem>>, vector<6x32xf32>
    %2 = vector.extract_strided_slice %1 {offsets = [0, 0], sizes = [1, 32], strides = [1, 1]} : vector<6x32xf32> to vector<1x32xf32>
    %3 = vector.extract_strided_slice %1 {offsets = [1, 0], sizes = [1, 32], strides = [1, 1]} : vector<6x32xf32> to vector<1x32xf32>
    %4 = vector.extract_strided_slice %1 {offsets = [2, 0], sizes = [1, 32], strides = [1, 1]} : vector<6x32xf32> to vector<1x32xf32>
    %5 = vector.extract_strided_slice %1 {offsets = [3, 0], sizes = [1, 32], strides = [1, 1]} : vector<6x32xf32> to vector<1x32xf32>
    %6 = vector.extract_strided_slice %1 {offsets = [4, 0], sizes = [1, 32], strides = [1, 1]} : vector<6x32xf32> to vector<1x32xf32>
    %7 = vector.extract_strided_slice %1 {offsets = [5, 0], sizes = [1, 32], strides = [1, 1]} : vector<6x32xf32> to vector<1x32xf32>
    %8 = vector.shape_cast %0 : vector<2x8x32xf32> to vector<2x1x8x32xf32>
    %9 = vector.shape_cast %8 : vector<2x1x8x32xf32> to vector<2x1x8x32xf32>
    %10 = vector.broadcast %9 : vector<2x1x8x32xf32> to vector<2x4x8x32xf32>
    %11 = vector.shape_cast %10 : vector<2x4x8x32xf32> to vector<8x8x32xf32>
    %c0_4 = arith.constant 0 : index
    %c0_5 = arith.constant 0 : index
    %c0_6 = arith.constant 0 : index
    %12 = vector.load %arg2[%c0_4, %c0_5, %c0_6] : memref<4x32x24xf32, #tpu.memory_space<vmem>>, vector<4x32x24xf32>
    %13 = vector.shape_cast %12 : vector<4x32x24xf32> to vector<1x4x32x24xf32>
    %14 = vector.shape_cast %13 : vector<1x4x32x24xf32> to vector<1x4x32x24xf32>
    %15 = vector.broadcast %14 : vector<1x4x32x24xf32> to vector<2x4x32x24xf32>
    %16 = vector.shape_cast %15 : vector<2x4x32x24xf32> to vector<8x32x24xf32>
    %c0_7 = arith.constant 0 : index
    %c0_8 = arith.constant 0 : index
    %c0_9 = arith.constant 0 : index
    %17 = vector.load %arg3[%c0_7, %c0_8, %c0_9] : memref<4x1x24xf32, #tpu.memory_space<vmem>>, vector<4x1x24xf32>
    %18 = vector.shape_cast %17 : vector<4x1x24xf32> to vector<1x4x1x24xf32>
    %19 = vector.shape_cast %18 : vector<1x4x1x24xf32> to vector<1x4x1x24xf32>
    %20 = vector.broadcast %19 : vector<1x4x1x24xf32> to vector<2x4x1x24xf32>
    %21 = vector.shape_cast %20 : vector<2x4x1x24xf32> to vector<8x1x24xf32>
    %c0_10 = arith.constant 0 : index
    %c0_11 = arith.constant 0 : index
    %c0_12 = arith.constant 0 : index
    %22 = vector.load %arg4[%c0_10, %c0_11, %c0_12] : memref<4x8x32xf32, #tpu.memory_space<vmem>>, vector<4x8x32xf32>
    %23 = vector.shape_cast %22 : vector<4x8x32xf32> to vector<1x4x8x32xf32>
    %24 = vector.shape_cast %23 : vector<1x4x8x32xf32> to vector<1x4x8x32xf32>
    %25 = vector.broadcast %24 : vector<1x4x8x32xf32> to vector<2x4x8x32xf32>
    %26 = vector.shape_cast %25 : vector<2x4x8x32xf32> to vector<8x8x32xf32>
    "tpu.trace_start"() <{level = 10 : i32, message = "gsd,gde->gse"}> : () -> ()
    %cst = arith.constant dense<0.000000e+00> : vector<8x8x24xf32>
    %27 = tpu.matmul %11, %16, %cst {dimension_numbers = #tpu.dot_dimension_numbers<[2], [1], [1], [2], [0, 0, 0, 1, 1, 2], [0], [0]>} : vector<8x8x32xf32>, vector<8x32x24xf32>, vector<8x8x24xf32> -> vector<8x8x24xf32>
    "tpu.trace_stop"() : () -> ()
    %28 = vector.broadcast %21 : vector<8x1x24xf32> to vector<8x8x24xf32>
    %29 = arith.addf %27, %28 : vector<8x8x24xf32>
    %30 = vector.extract_strided_slice %29 {offsets = [0, 0, 0], sizes = [8, 8, 8], strides = [1, 1, 1]} : vector<8x8x24xf32> to vector<8x8x8xf32>
    %31 = vector.extract_strided_slice %29 {offsets = [0, 0, 8], sizes = [8, 8, 8], strides = [1, 1, 1]} : vector<8x8x24xf32> to vector<8x8x8xf32>
    %32 = vector.extract_strided_slice %29 {offsets = [0, 0, 16], sizes = [8, 8, 8], strides = [1, 1, 1]} : vector<8x8x24xf32> to vector<8x8x8xf32>
    "tpu.trace_start"() <{level = 10 : i32, message = "gqd,gkd->gqk"}> : () -> ()
    %cst_13 = arith.constant dense<0.000000e+00> : vector<8x8x8xf32>
    %33 = tpu.matmul %30, %31, %cst_13 {dimension_numbers = #tpu.dot_dimension_numbers<[2], [2], [1], [1], [0, 0, 0, 1, 1, 1], [0], [0]>} : vector<8x8x8xf32>, vector<8x8x8xf32>, vector<8x8x8xf32> -> vector<8x8x8xf32>
    "tpu.trace_stop"() : () -> ()
    %cst_14 = arith.constant 0.353553385 : f32
    %34 = vector.broadcast %cst_14 : f32 to vector<8x8x8xf32>
    %35 = arith.mulf %33, %34 : vector<8x8x8xf32>
    %cst_15 = arith.constant dense<0xFF800000> : vector<8x8xf32>
    %36 = vector.multi_reduction <maximumf>, %35, %cst_15 [2] : vector<8x8x8xf32> to vector<8x8xf32>
    %37 = vector.shape_cast %36 : vector<8x8xf32> to vector<8x8x1xf32>
    %38 = vector.broadcast %37 : vector<8x8x1xf32> to vector<8x8x8xf32>
    %39 = arith.subf %35, %38 : vector<8x8x8xf32>
    %40 = math.exp %39 : vector<8x8x8xf32>
    %cst_16 = arith.constant dense<0.000000e+00> : vector<8x8xf32>
    %41 = vector.multi_reduction <add>, %40, %cst_16 [2] : vector<8x8x8xf32> to vector<8x8xf32>
    %42 = vector.shape_cast %41 : vector<8x8xf32> to vector<8x8x1xf32>
    %43 = tpu.reciprocal %42 {approx = true} : vector<8x8x1xf32> -> vector<8x8x1xf32>
    %44 = vector.broadcast %43 : vector<8x8x1xf32> to vector<8x8x8xf32>
    %45 = arith.mulf %40, %44 : vector<8x8x8xf32>
    %c0_17 = arith.constant 0 : index
    %c0_18 = arith.constant 0 : index
    %c0_19 = arith.constant 0 : index
    %46 = vector.load %arg9[%c0_17, %c0_18, %c0_19] : memref<8x8x8xf32, #tpu.memory_space<vmem>>, vector<8x8x8xf32>
    tpu.vector_store %arg9[%c0_17, %c0_18, %c0_19], %45 {strides = array<i32>} : memref<8x8x8xf32, #tpu.memory_space<vmem>>, vector<8x8x8xf32>,
    "tpu.trace_start"() <{level = 10 : i32, message = "gqk,gkd->gqd"}> : () -> ()
    %cst_20 = arith.constant dense<0.000000e+00> : vector<8x8x8xf32>
    %47 = tpu.matmul %45, %32, %cst_20 {dimension_numbers = #tpu.dot_dimension_numbers<[2], [1], [1], [2], [0, 0, 0, 1, 1, 2], [0], [0]>} : vector<8x8x8xf32>, vector<8x8x8xf32>, vector<8x8x8xf32> -> vector<8x8x8xf32>
    "tpu.trace_stop"() : () -> ()
    "tpu.trace_start"() <{level = 10 : i32, message = "gsd,gde->gse"}> : () -> ()
    %cst_21 = arith.constant dense<0.000000e+00> : vector<8x8x32xf32>
    %48 = tpu.matmul %47, %26, %cst_21 {dimension_numbers = #tpu.dot_dimension_numbers<[2], [1], [1], [2], [0, 0, 0, 1, 1, 2], [0], [0]>} : vector<8x8x8xf32>, vector<8x8x32xf32>, vector<8x8x32xf32> -> vector<8x8x32xf32>
    "tpu.trace_stop"() : () -> ()
    %49 = vector.shape_cast %48 : vector<8x8x32xf32> to vector<2x4x8x32xf32>
    %cst_22 = arith.constant dense<0.000000e+00> : vector<2x8x32xf32>
    %50 = vector.multi_reduction <add>, %49, %cst_22 [1] : vector<2x4x8x32xf32> to vector<2x8x32xf32>
    %51 = vector.shape_cast %2 : vector<1x32xf32> to vector<1x1x32xf32>
    %52 = vector.broadcast %51 : vector<1x1x32xf32> to vector<2x8x32xf32>
    %53 = arith.addf %50, %52 : vector<2x8x32xf32>
    %54 = arith.addf %0, %53 : vector<2x8x32xf32>
    %cst_23 = arith.constant dense<0.000000e+00> : vector<2x8xf32>
    %55 = vector.multi_reduction <add>, %54, %cst_23 [2] : vector<2x8x32xf32> to vector<2x8xf32>
    %56 = vector.shape_cast %55 : vector<2x8xf32> to vector<2x8x1xf32>
    %cst_24 = arith.constant 3.200000e+01 : f32
    %57 = vector.broadcast %cst_24 : f32 to vector<2x8x1xf32>
    %58 = arith.divf %56, %57 : vector<2x8x1xf32>
    %59 = vector.broadcast %58 : vector<2x8x1xf32> to vector<2x8x32xf32>
    %60 = arith.subf %54, %59 : vector<2x8x32xf32>
    %61 = vector.broadcast %58 : vector<2x8x1xf32> to vector<2x8x32xf32>
    %62 = arith.subf %54, %61 : vector<2x8x32xf32>
    %63 = arith.mulf %60, %62 : vector<2x8x32xf32>
    %cst_25 = arith.constant dense<0.000000e+00> : vector<2x8xf32>
    %64 = vector.multi_reduction <add>, %63, %cst_25 [2] : vector<2x8x32xf32> to vector<2x8xf32>
    %65 = vector.shape_cast %64 : vector<2x8xf32> to vector<2x8x1xf32>
    %cst_26 = arith.constant 3.200000e+01 : f32
    %66 = vector.broadcast %cst_26 : f32 to vector<2x8x1xf32>
    %67 = arith.divf %65, %66 : vector<2x8x1xf32>
    %68 = vector.broadcast %58 : vector<2x8x1xf32> to vector<2x8x32xf32>
    %69 = arith.subf %54, %68 : vector<2x8x32xf32>
    %cst_27 = arith.constant 9.99999974E-6 : f32
    %70 = vector.broadcast %cst_27 : f32 to vector<2x8x1xf32>
    %71 = arith.addf %67, %70 : vector<2x8x1xf32>
    %72 = math.rsqrt %71 : vector<2x8x1xf32>
    %73 = vector.broadcast %72 : vector<2x8x1xf32> to vector<2x8x32xf32>
    %74 = arith.mulf %69, %73 : vector<2x8x32xf32>
    %75 = vector.shape_cast %3 : vector<1x32xf32> to vector<1x1x32xf32>
    %76 = vector.broadcast %75 : vector<1x1x32xf32> to vector<2x8x32xf32>
    %77 = arith.mulf %74, %76 : vector<2x8x32xf32>
    %78 = vector.shape_cast %4 : vector<1x32xf32> to vector<1x1x32xf32>
    %79 = vector.broadcast %78 : vector<1x1x32xf32> to vector<2x8x32xf32>
    %80 = arith.addf %77, %79 : vector<2x8x32xf32>
    %c0_28 = arith.constant 0 : index
    %c0_29 = arith.constant 0 : index
    %c0_30 = arith.constant 0 : index
    %81 = vector.load %arg5[%c0_28, %c0_29, %c0_30] : memref<2x32x64xf32, #tpu.memory_space<vmem>>, vector<1x32x64xf32>
    %82 = vector.shape_cast %81 : vector<1x32x64xf32> to vector<32x64xf32>
    %83 = vector.shape_cast %82 : vector<32x64xf32> to vector<1x32x64xf32>
    %84 = vector.broadcast %83 : vector<1x32x64xf32> to vector<2x32x64xf32>
    %c1 = arith.constant 1 : index
    %c0_31 = arith.constant 0 : index
    %c0_32 = arith.constant 0 : index
    %85 = vector.load %arg5[%c1, %c0_31, %c0_32] : memref<2x32x64xf32, #tpu.memory_space<vmem>>, vector<1x32x64xf32>
    %86 = vector.shape_cast %85 : vector<1x32x64xf32> to vector<32x64xf32>
    %87 = vector.shape_cast %86 : vector<32x64xf32> to vector<1x32x64xf32>
    %88 = vector.broadcast %87 : vector<1x32x64xf32> to vector<2x32x64xf32>
    "tpu.trace_start"() <{level = 10 : i32, message = "bsd,bdf->bsf"}> : () -> ()
    %cst_33 = arith.constant dense<0.000000e+00> : vector<2x8x64xf32>
    %89 = tpu.matmul %80, %84, %cst_33 {dimension_numbers = #tpu.dot_dimension_numbers<[2], [1], [1], [2], [0, 0, 0, 1, 1, 2], [0], [0]>} : vector<2x8x32xf32>, vector<2x32x64xf32>, vector<2x8x64xf32> -> vector<2x8x64xf32>
    "tpu.trace_stop"() : () -> ()
    %c0_34 = arith.constant 0 : index
    %c0_35 = arith.constant 0 : index
    %90 = vector.load %arg6[%c0_34, %c0_35] : memref<1x64xf32, #tpu.memory_space<vmem>>, vector<1x64xf32>
    %91 = vector.shape_cast %90 : vector<1x64xf32> to vector<1x1x64xf32>
    %92 = vector.broadcast %91 : vector<1x1x64xf32> to vector<2x8x64xf32>
    %93 = arith.addf %89, %92 : vector<2x8x64xf32>
    %cst_36 = arith.constant 0.000000e+00 : f32
    %94 = vector.broadcast %cst_36 : f32 to vector<2x8x64xf32>
    %95 = arith.maximumf %93, %94 : vector<2x8x64xf32>
    "tpu.trace_start"() <{level = 10 : i32, message = "bsf,bdf->bsd"}> : () -> ()
    %cst_37 = arith.constant dense<0.000000e+00> : vector<2x8x32xf32>
    %96 = tpu.matmul %95, %88, %cst_37 {dimension_numbers = #tpu.dot_dimension_numbers<[2], [2], [1], [1], [0, 0, 0, 1, 1, 1], [0], [0]>} : vector<2x8x64xf32>, vector<2x32x64xf32>, vector<2x8x32xf32> -> vector<2x8x32xf32>
    "tpu.trace_stop"() : () -> ()
    %97 = vector.shape_cast %5 : vector<1x32xf32> to vector<1x1x32xf32>
    %98 = vector.broadcast %97 : vector<1x1x32xf32> to vector<2x8x32xf32>
    %99 = arith.addf %96, %98 : vector<2x8x32xf32>
    %100 = arith.addf %80, %99 : vector<2x8x32xf32>
    %cst_38 = arith.constant dense<0.000000e+00> : vector<2x8xf32>
    %101 = vector.multi_reduction <add>, %100, %cst_38 [2] : vector<2x8x32xf32> to vector<2x8xf32>
    %102 = vector.shape_cast %101 : vector<2x8xf32> to vector<2x8x1xf32>
    %cst_39 = arith.constant 3.200000e+01 : f32
    %103 = vector.broadcast %cst_39 : f32 to vector<2x8x1xf32>
    %104 = arith.divf %102, %103 : vector<2x8x1xf32>
    %105 = vector.broadcast %104 : vector<2x8x1xf32> to vector<2x8x32xf32>
    %106 = arith.subf %100, %105 : vector<2x8x32xf32>
    %107 = vector.broadcast %104 : vector<2x8x1xf32> to vector<2x8x32xf32>
    %108 = arith.subf %100, %107 : vector<2x8x32xf32>
    %109 = arith.mulf %106, %108 : vector<2x8x32xf32>
    %cst_40 = arith.constant dense<0.000000e+00> : vector<2x8xf32>
    %110 = vector.multi_reduction <add>, %109, %cst_40 [2] : vector<2x8x32xf32> to vector<2x8xf32>
    %111 = vector.shape_cast %110 : vector<2x8xf32> to vector<2x8x1xf32>
    %cst_41 = arith.constant 3.200000e+01 : f32
    %112 = vector.broadcast %cst_41 : f32 to vector<2x8x1xf32>
    %113 = arith.divf %111, %112 : vector<2x8x1xf32>
    %114 = vector.broadcast %104 : vector<2x8x1xf32> to vector<2x8x32xf32>
    %115 = arith.subf %100, %114 : vector<2x8x32xf32>
    %cst_42 = arith.constant 9.99999974E-6 : f32
    %116 = vector.broadcast %cst_42 : f32 to vector<2x8x1xf32>
    %117 = arith.addf %113, %116 : vector<2x8x1xf32>
    %118 = math.rsqrt %117 : vector<2x8x1xf32>
    %119 = vector.broadcast %118 : vector<2x8x1xf32> to vector<2x8x32xf32>
    %120 = arith.mulf %115, %119 : vector<2x8x32xf32>
    %121 = vector.shape_cast %6 : vector<1x32xf32> to vector<1x1x32xf32>
    %122 = vector.broadcast %121 : vector<1x1x32xf32> to vector<2x8x32xf32>
    %123 = arith.mulf %120, %122 : vector<2x8x32xf32>
    %124 = vector.shape_cast %7 : vector<1x32xf32> to vector<1x1x32xf32>
    %125 = vector.broadcast %124 : vector<1x1x32xf32> to vector<2x8x32xf32>
    %126 = arith.addf %123, %125 : vector<2x8x32xf32>
    %c0_43 = arith.constant 0 : index
    %c0_44 = arith.constant 0 : index
    %c0_45 = arith.constant 0 : index
    %127 = vector.load %arg8[%c0_43, %c0_44, %c0_45] : memref<2x8x32xf32, #tpu.memory_space<vmem>>, vector<2x8x32xf32>
    tpu.vector_store %arg8[%c0_43, %c0_44, %c0_45], %126 {strides = array<i32>} : memref<2x8x32xf32, #tpu.memory_space<vmem>>, vector<2x8x32xf32>,
    return
  }
  func.func @transform_0(%arg0: i32) -> (i32, i32, i32) {
    %c0_i32 = arith.constant 0 : i32
    %c0_i32_0 = arith.constant 0 : i32
    %c0_i32_1 = arith.constant 0 : i32
    %c0_i32_2 = arith.constant 0 : i32
    return %c0_i32, %c0_i32_0, %c0_i32_1 : i32, i32, i32
  }
  func.func @transform_1(%arg0: i32) -> (i32, i32, i32) {
    %c0_i32 = arith.constant 0 : i32
    %c0_i32_0 = arith.constant 0 : i32
    %c0_i32_1 = arith.constant 0 : i32
    %c0_i32_2 = arith.constant 0 : i32
    return %c0_i32, %c0_i32_0, %c0_i32_1 : i32, i32, i32
  }
  func.func @transform_2(%arg0: i32) -> (i32, i32, i32) {
    %c0_i32 = arith.constant 0 : i32
    %c0_i32_0 = arith.constant 0 : i32
    %c0_i32_1 = arith.constant 0 : i32
    %c0_i32_2 = arith.constant 0 : i32
    return %c0_i32, %c0_i32_0, %c0_i32_1 : i32, i32, i32
  }
  func.func @transform_3(%arg0: i32) -> (i32, i32, i32) {
    %c0_i32 = arith.constant 0 : i32
    %c0_i32_0 = arith.constant 0 : i32
    %c0_i32_1 = arith.constant 0 : i32
    %c0_i32_2 = arith.constant 0 : i32
    return %c0_i32, %c0_i32_0, %c0_i32_1 : i32, i32, i32
  }
  func.func @transform_4(%arg0: i32) -> (i32, i32, i32) {
    %c0_i32 = arith.constant 0 : i32
    %c0_i32_0 = arith.constant 0 : i32
    %c0_i32_1 = arith.constant 0 : i32
    %c0_i32_2 = arith.constant 0 : i32
    return %c0_i32, %c0_i32_0, %c0_i32_1 : i32, i32, i32
  }
  func.func @transform_5(%arg0: i32) -> (i32, i32) {
    %c0_i32 = arith.constant 0 : i32
    %c0_i32_0 = arith.constant 0 : i32
    %c0_i32_1 = arith.constant 0 : i32
    return %c0_i32, %c0_i32_0 : i32, i32
  }
  func.func @transform_6(%arg0: i32) -> (i32, i32) {
    %c0_i32 = arith.constant 0 : i32
    %c0_i32_0 = arith.constant 0 : i32
    %c0_i32_1 = arith.constant 0 : i32
    return %c0_i32, %c0_i32_0 : i32, i32
  }
  func.func @transform_7(%arg0: i32) -> (i32, i32, i32) {
    %c0_i32 = arith.constant 0 : i32
    %c0_i32_0 = arith.constant 0 : i32
    %c0_i32_1 = arith.constant 0 : i32
    %c0_i32_2 = arith.constant 0 : i32
    return %c0_i32, %c0_i32_0, %c0_i32_1 : i32, i32, i32
  }
  func.func @transform_8(%arg0: i32) -> (i32, i32, i32) {
    %c0_i32 = arith.constant 0 : i32
    %c0_i32_0 = arith.constant 0 : i32
    %c0_i32_1 = arith.constant 0 : i32
    %c0_i32_2 = arith.constant 0 : i32
    return %c0_i32, %c0_i32_0, %c0_i32_1 : i32, i32, i32
  }
}

</mosaic_0001>

<bundles_post_ra>
// kernel: encoder_layer_pallas.1
= control target key start
LH: loop header
LB: loop body
LE: loop exit
PB: predicated region body
PF: predicated region fallthrough
CT: control target
= control target key end

     0   :  { %14 = vsyncpa [#allocation3], 0  ;;  %v3617_v3 = vmov 0.0|0.0   ;;  %vm3618_vm0 = vmmov 0   ;;  %v3619_v11 = vmov 0.0   ;;  %s4131_s0 = inlined_call_operand.vmem [shape: f32[2,8,32], index: 0, kind: input, shape index: {}]   ;;  %s4132_s1 = inlined_call_operand.vmem [shape: f32[4,32,24], index: 1, kind: input, shape index: {}]   ;;  %s4133_s2 = inlined_call_operand.vmem [shape: f32[4,1,24], index: 2, kind: input, shape index: {}]   ;;  %s4134_s3 = inlined_call_operand.vmem [shape: f32[4,8,32], index: 3, kind: input, shape index: {}]   ;;  %s4135_s4 = inlined_call_operand.vmem [shape: f32[2,32,64], index: 4, kind: input, shape index: {}]   ;;  %s4136_s5 = inlined_call_operand.vmem [shape: f32[1,64], index: 5, kind: input, shape index: {}]   ;;  %s4137_s6 = inlined_call_operand.vmem [shape: f32[6,32], index: 6, kind: input, shape index: {}]   ;;  %s4138_s7 = inlined_call_operand.hbm [shape: f32[2,8,32], index: 7, kind: output, shape index: {0}]   ;;  %s4139_s8 = inlined_call_operand.hbm [shape: f32[8,8,8], index: 8, kind: output, shape index: {1}]  }
   0x1   :  { %v33_v0 = vld [vmem:[%s4132_s1] sm:$0xff]  ;;  %v34_v1 = vld [vmem:[%s4132_s1 + $0x8] sm:$0xff]  ;;  %3444 = vmatprep.subr.bf16.mxu0 %v3617_v3  ;;  %3450 = vmatprep.subr.bf16.mxu1 %v3617_v3  ;;  %v35_v6 = vld [vmem:[%s4132_s1 + $0x10] sm:$0xff] }
   0x2   :  { %v37_v2 = vld [vmem:[%s4132_s1 + $0x20] sm:$0xff]  ;;  %v3445_v4 = vpack.c.bf16 %v34_v1, %v33_v0  ;;  %v38_v5 = vld [vmem:[%s4132_s1 + $0x28] sm:$0xff]  ;;  %v36_v7 = vld [vmem:[%s4132_s1 + $0x18] sm:$0xff]  ;;  %3200 = vmatprep.mubr.msk.f32.mxu0 %vm3618_vm0, %v3619_v11  ;;  %3211 = vmatprep.mubr.msk.f32.mxu1 %vm3618_vm0, %v3619_v11 }
   0x3   :  { %v3451_v8 = vpack.c.bf16 %v38_v5, %v37_v2  ;;  %v39_v9 = vld [vmem:[%s4132_s1 + $0x30] sm:$0xff]  ;;  %v40_v10 = vld [vmem:[%s4132_s1 + $0x38] sm:$0xff]  ;;  %v3448_v12 = vpack.c.bf16 %v36_v7, %v35_v6  ;;  %v41_v14 = vld [vmem:[%s4132_s1 + $0x40] sm:$0xff] }
   0x4   :  { %3446 = vmatpush3.bf16.msra.mxu0 %v3445_v4  ;;  %v3454_v13 = vpack.c.bf16 %v40_v10, %v39_v9  ;;  %v42_v15 = vld [vmem:[%s4132_s1 + $0x48] sm:$0xff]  ;;  %v45_v16 = vld [vmem:[%s4132_s1 + $0x60] sm:$0xff] }
   0x5   :  { %3452 = vmatpush3.bf16.msra.mxu1 %v3451_v8  ;;  %3447 = vmatprep.subr.bf16.mxu0 %v3617_v3  ;;  %v46_v17 = vld [vmem:[%s4132_s1 + $0x68] sm:$0xff] }
   0x6   :  { %3453 = vmatprep.subr.bf16.mxu1 %v3617_v3 }
   0x7   :  { %15 = vsyncpa [#allocation5], 0  ;;  %v3718_v18 = vld [vmem:[%s4131_s0] sm:$0xff]  ;;  %vm81_vm1 = vcmask 261120   ;;  %v3457_v19 = vpack.c.bf16 %v42_v15, %v41_v14  ;;  %v3463_v20 = vpack.c.bf16 %v46_v17, %v45_v16  ;;  %v43_v21 = vld [vmem:[%s4132_s1 + $0x50] sm:$0xff]  ;;  %s3620_s21 = smov 120  }
   0x8   :  { %3449 = vmatpush3.bf16.msra.mxu0 %v3448_v12  ;;  %v44_v22 = vld [vmem:[%s4132_s1 + $0x58] sm:$0xff]  ;;  %v47_v23 = vld [vmem:[%s4132_s1 + $0x70] sm:$0xff]  ;;  %v3759_v27 = vld [vmem:[%s4131_s0 + $0x8] sm:$0xff]  ;;  %vm651_vm2 = vcmask 64512   ;;  %vm2790_vm3 = vcmask 523264  }
   0x9   :  { %3455 = vmatpush3.bf16.msra.mxu1 %v3454_v13  ;;  %3456 = vmatprep.subr.bf16.mxu0 %v3617_v3  ;;  %v48_v24 = vld [vmem:[%s4132_s1 + $0x78] sm:$0xff]  ;;  %v3460_v25 = vpack.c.bf16 %v44_v22, %v43_v21  ;;  %v3023_v28 = vld [vmem:[%s4133_s2] ss:$0 sm:$0xff]  ;;  %v3024_v30 = vld [vmem:[%s4133_s2 + $0x1] ss:$0 sm:$0xff] }
   0xa   :  { %3462 = vmatprep.subr.bf16.mxu1 %v3617_v3  ;;  %v3466_v26 = vpack.c.bf16 %v48_v24, %v47_v23  ;;  %v3025_v36 = vld [vmem:[%s4133_s2 + $0x2] ss:$0 sm:$0xff]  ;;  %v3026_v38 = vld [vmem:[%s4133_s2 + $0x3] ss:$0 sm:$0xff]  ;;  %s3621_s2 = smov 112   ;;  %vm4058_vm4 = vmpackc.low %vm2790_vm3, %vm2790_vm3 }
   0xb   :  { %3201 = vmatmul.mubr.msk.f32.vlgmr.msra.gmra.mrb[0].mxu0 %vm81_vm1, %v3718_v18 }
   0xc   :  { %3212 = vmatmul.mubr.msk.f32.vlgmr.msra.gmra.mrb[0].mxu1 %vm81_vm1, %v3718_v18  ;;  %3458 = vmatpush3.bf16.msra.mxu0 %v3457_v19 }
   0xd   :  { %3464 = vmatpush3.bf16.msra.mxu1 %v3463_v20  ;;  %3459 = vmatprep.subr.bf16.mxu0 %v3617_v3 }
   0xe   :  { %3465 = vmatprep.subr.bf16.mxu1 %v3617_v3  ;;  %3222 = vmatprep.mubr.msk.f32.mxu0 %vm3618_vm0, %v3619_v11 }
   0xf   :  { %3233 = vmatprep.mubr.msk.f32.mxu1 %vm3618_vm0, %v3619_v11 }
  0x10   :  { %3461 = vmatpush3.bf16.msra.mxu0 %v3460_v25 }
  0x11   :  { %3467 = vmatpush3.bf16.msra.mxu1 %v3466_v26  ;;  %3468 = vmatprep.subr.bf16.mxu0 %v3617_v3 }
  0x12   :  { %3474 = vmatprep.subr.bf16.mxu1 %v3617_v3 }
  0x13   :  { %3223 = vmatmul.mubr.msk.f32.vlgmr.msra.gmra.mrb[2].mxu0 %vm81_vm1, %v3718_v18 }
  0x14   :  { %3234 = vmatmul.mubr.msk.f32.vlgmr.msra.gmra.mrb[2].mxu1 %vm81_vm1, %v3718_v18  ;;  %3470 = vmatpush3.bf16.msra.mxu0 %v3445_v4 }
  0x15   :  { %3476 = vmatpush3.bf16.msra.mxu1 %v3451_v8  ;;  %3471 = vmatprep.subr.bf16.mxu0 %v3617_v3 }
  0x16   :  { %3477 = vmatprep.subr.bf16.mxu1 %v3617_v3  ;;  %3244 = vmatprep.mubr.msk.f32.mxu0 %vm3618_vm0, %v3619_v11 }
  0x17   :  { %3255 = vmatprep.mubr.msk.f32.mxu1 %vm3618_vm0, %v3619_v11 }
  0x18   :  { %3473 = vmatpush3.bf16.msra.mxu0 %v3448_v12 }
  0x19   :  { %3479 = vmatpush3.bf16.msra.mxu1 %v3454_v13  ;;  %3480 = vmatprep.subr.bf16.mxu0 %v3617_v3 }
  0x1a   :  { %3486 = vmatprep.subr.bf16.mxu1 %v3617_v3 }
  0x1b   :  { %3245 = vmatmul.mubr.msk.f32.vlgmr.msra.gmra.mrb[4].mxu0 %vm81_vm1, %v3759_v27 }
  0x1c   :  { %3256 = vmatmul.mubr.msk.f32.vlgmr.msra.gmra.mrb[4].mxu1 %vm81_vm1, %v3759_v27  ;;  %3482 = vmatpush3.bf16.msra.mxu0 %v3457_v19 }
  0x1d   :  { %3488 = vmatpush3.bf16.msra.mxu1 %v3463_v20  ;;  %3483 = vmatprep.subr.bf16.mxu0 %v3617_v3 }
  0x1e   :  { %3489 = vmatprep.subr.bf16.mxu1 %v3617_v3  ;;  %3266 = vmatprep.mubr.msk.f32.mxu0 %vm3618_vm0, %v3619_v11 }
  0x1f   :  { %3277 = vmatprep.mubr.msk.f32.mxu1 %vm3618_vm0, %v3619_v11 }
  0x20   :  { %3485 = vmatpush3.bf16.msra.mxu0 %v3460_v25 }
  0x21   :  { %3491 = vmatpush3.bf16.msra.mxu1 %v3466_v26  ;;  %3280 = vmatprep.subr.mxu0 %v3619_v11 }
  0x22   :  { %3285 = vmatprep.subr.mxu1 %v3619_v11 }
  0x23   :  { %3267 = vmatmul.mubr.msk.f32.vlgmr.msra.gmra.mrb[6].mxu0 %vm81_vm1, %v3759_v27 }
  0x24   :  { %3278 = vmatmul.mubr.msk.f32.vlgmr.msra.gmra.mrb[6].mxu1 %vm81_vm1, %v3759_v27  ;;  %3282 = vmatprep.mubr.msk.f32.mxu0 %vm3618_vm0, %v3619_v11 }
  0x25   :  { %3287 = vmatprep.mubr.msk.f32.mxu1 %vm3618_vm0, %v3619_v11 }
  0xde   :  { %v151_v29 = vpop.f32.mrb[0].mxu0 }
  0xdf   :  { %v3789_v31 = vadd.f32 %v3023_v28, %v151_v29  ;;  %v3202_v32 = vpop.f32.mrb[1].mxu0  ;;  %v221_v33 = vpop.f32.mrb[0].mxu1 }
  0xe0   :  { %v3213_v34 = vpop.f32.mrb[1].mxu1  ;;  %v3791_v35 = vadd.f32 %v3024_v30, %v221_v33 }
  0xe1   :  { %649 = vrot.lane.b32.xlu0 %v3789_v31, %s3620_s21 }
  0xe5   :  { %727 = vrot.lane.b32.xlu0 %v3791_v35, %s3620_s21 }
  0xe6   :  { %v291_v37 = vpop.f32.mrb[2].mxu0 }
  0xe7   :  { %v3801_v39 = vadd.f32 %v3025_v36, %v291_v37  ;;  %v3224_v40 = vpop.f32.mrb[3].mxu0  ;;  %v361_v41 = vpop.f32.mrb[2].mxu1 }
  0xe8   :  { %v3235_v42 = vpop.f32.mrb[3].mxu1  ;;  %v3803_v43 = vadd.f32 %v3026_v38, %v361_v41 }
  0xe9   :  { %804 = vrot.lane.b32.xlu1 %v3801_v39, %s3620_s21 }
  0xed   :  { %881 = vrot.lane.b32.xlu1 %v3803_v43, %s3620_s21 }
  0xee   :  { %v434_v44 = vpop.f32.mrb[4].mxu0 }
  0xef   :  { %v3807_v45 = vadd.f32 %v3023_v28, %v434_v44  ;;  %v504_v46 = vpop.f32.mrb[4].mxu1  ;;  %v3246_v47 = vpop.f32.mrb[5].mxu0 }
  0xf0   :  { %v3809_v48 = vadd.f32 %v3024_v30, %v504_v46  ;;  %v3257_v49 = vpop.f32.mrb[5].mxu1 }
  0xf1   :  { %958 = vrot.lane.b32.xlu0 %v3807_v45, %s3620_s21 }
  0xf2   :  { %1035 = vrot.lane.b32.xlu1 %v3809_v48, %s3620_s21 }
  0xf6   :  { %v574_v50 = vpop.f32.mrb[6].mxu0 }
  0xf7   :  { %v3813_v51 = vadd.f32 %v3025_v36, %v574_v50  ;;  %v644_v52 = vpop.f32.mrb[6].mxu1  ;;  %v3268_v53 = vpop.f32.mrb[7].mxu0 }
  0xf8   :  { %v3815_v54 = vadd.f32 %v3026_v38, %v644_v52  ;;  %v3279_v55 = vpop.f32.mrb[7].mxu1 }
  0xf9   :  { %1112 = vrot.lane.b32.xlu0 %v3813_v51, %s3620_s21 }
  0xfa   :  { %1189 = vrot.lane.b32.xlu1 %v3815_v54, %s3620_s21 }
 0x153   :  { %v650_v56 = vpop.permute.xlu0 %649 }
 0x154   :  { %3281 = vmatpush3.xpose.msk.msra.mxu0 %vm651_vm2, %v650_v56 }
 0x155   :  { %3290 = vmatprep.subr.mxu0 %v3619_v11 }
 0x157   :  { %3283 = vmatmul.mubr.msk.f32.vlgmr.msra.gmra.mrb[8].mxu0 %vm651_vm2, %v3789_v31  ;;  %v728_v57 = vpop.permute.xlu0 %727 }
 0x158   :  { %3286 = vmatpush3.xpose.msk.msra.mxu1 %vm651_vm2, %v728_v57  ;;  %3292 = vmatprep.mubr.msk.f32.mxu0 %vm3618_vm0, %v3619_v11 }
 0x159   :  { %3295 = vmatprep.subr.mxu1 %v3619_v11 }
 0x15b   :  { %3288 = vmatmul.mubr.msk.f32.vlgmr.msra.gmra.mrb[8].mxu1 %vm651_vm2, %v3791_v35  ;;  %v805_v58 = vpop.permute.xlu1 %804 }
 0x15c   :  { %3291 = vmatpush3.xpose.msk.msra.mxu0 %vm651_vm2, %v805_v58  ;;  %3297 = vmatprep.mubr.msk.f32.mxu1 %vm3618_vm0, %v3619_v11 }
 0x15d   :  { %3300 = vmatprep.subr.mxu0 %v3619_v11 }
 0x15f   :  { %3293 = vmatmul.mubr.msk.f32.vlgmr.msra.gmra.mrb[10].mxu0 %vm651_vm2, %v3801_v39  ;;  %v882_v59 = vpop.permute.xlu1 %881 }
 0x160   :  { %3296 = vmatpush3.xpose.msk.msra.mxu1 %vm651_vm2, %v882_v59  ;;  %3302 = vmatprep.mubr.msk.f32.mxu0 %vm3618_vm0, %v3619_v11 }
 0x161   :  { %3305 = vmatprep.subr.mxu1 %v3619_v11 }
 0x163   :  { %3298 = vmatmul.mubr.msk.f32.vlgmr.msra.gmra.mrb[10].mxu1 %vm651_vm2, %v3803_v43  ;;  %v959_v60 = vpop.permute.xlu0 %958 }
 0x164   :  { %v1036_v61 = vpop.permute.xlu1 %1035  ;;  %3301 = vmatpush3.xpose.msk.msra.mxu0 %vm651_vm2, %v959_v60  ;;  %3307 = vmatprep.mubr.msk.f32.mxu1 %vm3618_vm0, %v3619_v11 }
 0x165   :  { %3306 = vmatpush3.xpose.msk.msra.mxu1 %vm651_vm2, %v1036_v61  ;;  %3310 = vmatprep.subr.mxu0 %v3619_v11 }
 0x166   :  { %3315 = vmatprep.subr.mxu1 %v3619_v11 }
 0x167   :  { %3303 = vmatmul.mubr.msk.f32.vlgmr.msra.gmra.mrb[12].mxu0 %vm651_vm2, %v3807_v45 }
 0x168   :  { %3308 = vmatmul.mubr.msk.f32.vlgmr.msra.gmra.mrb[12].mxu1 %vm651_vm2, %v3809_v48  ;;  %3312 = vmatprep.mubr.msk.f32.mxu0 %vm3618_vm0, %v3619_v11 }
 0x169   :  { %3317 = vmatprep.mubr.msk.f32.mxu1 %vm3618_vm0, %v3619_v11 }
 0x16b   :  { %v1113_v62 = vpop.permute.xlu0 %1112 }
 0x16c   :  { %v1190_v63 = vpop.permute.xlu1 %1189  ;;  %3311 = vmatpush3.xpose.msk.msra.mxu0 %vm651_vm2, %v1113_v62 }
 0x16d   :  { %3316 = vmatpush3.xpose.msk.msra.mxu1 %vm651_vm2, %v1190_v63  ;;  %3320 = vmatprep.subr.mxu0 %v3619_v11 }
 0x16e   :  { %3325 = vmatprep.subr.mxu1 %v3619_v11 }
 0x16f   :  { %3313 = vmatmul.mubr.msk.f32.vlgmr.msra.gmra.mrb[14].mxu0 %vm651_vm2, %v3813_v51 }
 0x170   :  { %3318 = vmatmul.mubr.msk.f32.vlgmr.msra.gmra.mrb[14].mxu1 %vm651_vm2, %v3815_v54  ;;  %3322 = vmatprep.mubr.msk.f32.mxu0 %vm3618_vm0, %v3619_v11 }
 0x171   :  { %3327 = vmatprep.mubr.msk.f32.mxu1 %vm3618_vm0, %v3619_v11 }
 0x22a   :  { %v722_v0 = vpop.f32.mrb[8].mxu0 }
 0x22b   :  { %v1265_v1 = vmul.f32 0.35355338, %v722_v0  ;;  %v3284_v2 = vpop.f32.mrb[9].mxu0 }
 0x22d   :  { %v1273_v4 = vsel %vm651_vm2, %v1265_v1, -inf }
 0x22e   :  { %v799_v5 = vpop.f32.mrb[8].mxu1  ;;  %1274 = vmax.xlane.f32.xlu0 %v1273_v4 }
 0x22f   :  { %v1266_v6 = vmul.f32 0.35355338, %v799_v5  ;;  %v3289_v7 = vpop.f32.mrb[9].mxu1 }
 0x231   :  { %v1276_v8 = vsel %vm651_vm2, %v1266_v6, -inf }
 0x232   :  { %1277 = vmax.xlane.f32.xlu1 %v1276_v8  ;;  %v876_v9 = vpop.f32.mrb[10].mxu0 }
 0x233   :  { %v1267_v10 = vmul.f32 0.35355338, %v876_v9  ;;  %v3294_v12 = vpop.f32.mrb[11].mxu0 }
 0x235   :  { %v1279_v13 = vsel %vm651_vm2, %v1267_v10, -inf }
 0x236   :  { %v953_v14 = vpop.f32.mrb[10].mxu1  ;;  %1280 = vmax.xlane.f32.xlu0 %v1279_v13 }
 0x237   :  { %v1268_v15 = vmul.f32 0.35355338, %v953_v14  ;;  %v3299_v16 = vpop.f32.mrb[11].mxu1 }
 0x239   :  { %v1282_v17 = vsel %vm651_vm2, %v1268_v15, -inf }
 0x23a   :  { %1283 = vmax.xlane.f32.xlu0 %v1282_v17  ;;  %v1030_v19 = vpop.f32.mrb[12].mxu0 }
 0x23b   :  { %v1107_v20 = vpop.f32.mrb[12].mxu1  ;;  %v1269_v21 = vmul.f32 0.35355338, %v1030_v19  ;;  %v3304_v22 = vpop.f32.mrb[13].mxu0 }
 0x23c   :  { %v1270_v23 = vmul.f32 0.35355338, %v1107_v20  ;;  %v3309_v24 = vpop.f32.mrb[13].mxu1 }
 0x23d   :  { %v1285_v25 = vsel %vm651_vm2, %v1269_v21, -inf }
 0x23e   :  { %v1288_v26 = vsel %vm651_vm2, %v1270_v23, -inf  ;;  %1286 = vmax.xlane.f32.xlu1 %v1285_v25 }
 0x23f   :  { %1289 = vmax.xlane.f32.xlu0 %v1288_v26 }
 0x242   :  { %v1184_v28 = vpop.f32.mrb[14].mxu0 }
 0x243   :  { %v1271_v29 = vmul.f32 0.35355338, %v1184_v28  ;;  %v1261_v30 = vpop.f32.mrb[14].mxu1  ;;  %v3314_v32 = vpop.f32.mrb[15].mxu0 }
 0x244   :  { %v1272_v33 = vmul.f32 0.35355338, %v1261_v30  ;;  %v3319_v34 = vpop.f32.mrb[15].mxu1 }
 0x245   :  { %v1291_v36 = vsel %vm651_vm2, %v1271_v29, -inf }
 0x246   :  { %v1294_v37 = vsel %vm651_vm2, %v1272_v33, -inf  ;;  %1292 = vmax.xlane.f32.xlu1 %v1291_v36 }
 0x247   :  { %1295 = vmax.xlane.f32.xlu0 %v1294_v37 }
 0x257   :  { %1369 = vrot.lane.b32.xlu1 %v3789_v31, %s3621_s2 }
 0x25b   :  { %1521 = vrot.lane.b32.xlu1 %v3801_v39, %s3621_s2 }
 0x25d   :  { %1445 = vrot.lane.b32.xlu0 %v3791_v35, %s3621_s2 }
 0x25f   :  { %1597 = vrot.lane.b32.xlu1 %v3803_v43, %s3621_s2 }
 0x261   :  { %1673 = vrot.lane.b32.xlu0 %v3807_v45, %s3621_s2 }
 0x263   :  { %1749 = vrot.lane.b32.xlu1 %v3809_v48, %s3621_s2 }
 0x2bb   :  { %v1275_v38 = vpop.xlane.xlu0 %1274 }
 0x2bc   :  { %v1297_v40 = vsub.f32 %v1265_v1, %v1275_v38 }
 0x2be   :  { %v1305_v41 = vmul.f32 1.442695, %v1297_v40 }
 0x2bf   :  { %v1278_v42 = vpop.xlane.xlu1 %1277 }
 0x2c0   :  { %3529 = vpow2.f32 %v1305_v41  ;;  %v1298_v31 = vsub.f32 %v1266_v6, %v1278_v42 }
 0x2c2   :  { %v1307_v44 = vmul.f32 1.442695, %v1298_v31 }
 0x2c3   :  { %v1281_v39 = vpop.xlane.xlu0 %1280 }
 0x2c4   :  { %3531 = vpow2.f32 %v1307_v44  ;;  %v1299_v46 = vsub.f32 %v1267_v10, %v1281_v39 }
 0x2c6   :  { %v1309_v35 = vmul.f32 1.442695, %v1299_v46 }
 0x2c7   :  { %v1284_v47 = vpop.xlane.xlu0 %1283 }
 0x2c8   :  { %3533 = vpow2.f32 %v1309_v35  ;;  %v1300_v43 = vsub.f32 %v1268_v15, %v1284_v47 }
 0x2ca   :  { %v3530_v49 = vpop.eup %3529  ;;  %v1311_v50 = vmul.f32 1.442695, %v1300_v43 }
 0x2cb   :  { %v1287_v45 = vpop.xlane.xlu1 %1286  ;;  %v1321_v52 = vsel %vm651_vm2, %v3530_v49, 0.0 }
 0x2cc   :  { %3535 = vpow2.f32 %v1311_v50  ;;  %v1290_v48 = vpop.xlane.xlu0 %1289  ;;  %v1301_v53 = vsub.f32 %v1269_v21, %v1287_v45  ;;  %1322 = vadd.xlane.f32.xlu1 %v1321_v52  ;;  %v53_v50 = vld [vmem:[%s4134_s3] sm:$0xff]  ;;  %v54_v45 = vld [vmem:[%s4134_s3 + $0x8] sm:$0xff]  ;;  %v55_v52 = vld [vmem:[%s4134_s3 + $0x10] sm:$0xff] }
 0x2cd   :  { %v1302_v55 = vsub.f32 %v1270_v23, %v1290_v48 }
 0x2ce   :  { %v3532_v56 = vpop.eup %3531  ;;  %v1313_v57 = vmul.f32 1.442695, %v1301_v53 }
 0x2cf   :  { %v1315_v58 = vmul.f32 1.442695, %v1302_v55  ;;  %v1324_v59 = vsel %vm651_vm2, %v3532_v56, 0.0  ;;  %v56_v55 = vld [vmem:[%s4134_s3 + $0x18] sm:$0xff] }
 0x2d0   :  { %3537 = vpow2.f32 %v1313_v57  ;;  %1325 = vadd.xlane.f32.xlu0 %v1324_v59 }
 0x2d1   :  { %3539 = vpow2.f32 %v1315_v58 }
 0x2d2   :  { %v3889_v60 = vpop.eup %3533 }
 0x2d3   :  { %v1293_v61 = vpop.xlane.xlu1 %1292  ;;  %v1327_v62 = vsel %vm651_vm2, %v3889_v60, 0.0 }
 0x2d4   :  { %v1296_v63 = vpop.xlane.xlu0 %1295  ;;  %v1303_v0 = vsub.f32 %v1271_v29, %v1293_v61  ;;  %1328 = vadd.xlane.f32.xlu1 %v1327_v62 }
 0x2d5   :  { %v1304_v1 = vsub.f32 %v1272_v33, %v1296_v63 }
 0x2d6   :  { %v3893_v2 = vpop.eup %3535  ;;  %v1317_v4 = vmul.f32 1.442695, %v1303_v0 }
 0x2d7   :  { %v1319_v5 = vmul.f32 1.442695, %v1304_v1  ;;  %v1370_v6 = vpop.permute.xlu1 %1369  ;;  %v1330_v7 = vsel %vm651_vm2, %v3893_v2, 0.0 }
 0x2d8   :  { %3541 = vpow2.f32 %v1317_v4  ;;  %v1446_v8 = vpop.permute.xlu0 %1445  ;;  %1331 = vadd.xlane.f32.xlu0 %v1330_v7  ;;  %3321 = vmatpush3.msra.mxu0 %v1370_v6 }
 0x2d9   :  { %3543 = vpow2.f32 %v1319_v5  ;;  %3326 = vmatpush3.msra.mxu1 %v1446_v8  ;;  %3330 = vmatprep.subr.mxu0 %v3619_v11  ;;  %v2575_v8 = vlaneseq }
 0x2da   :  { %v3898_v9 = vpop.eup %3537  ;;  %3335 = vmatprep.subr.mxu1 %v3619_v11 }
 0x2db   :  { %v3901_v10 = vpop.eup %3539  ;;  %v1333_v12 = vsel %vm651_vm2, %v3898_v9, 0.0  ;;  %v1522_v19 = vpop.permute.xlu1 %1521 }
 0x2dc   :  { %v1336_v13 = vsel %vm651_vm2, %v3901_v10, 0.0  ;;  %1334 = vadd.xlane.f32.xlu1 %v1333_v12  ;;  %v1674_v22 = vpop.permute.xlu0 %1673  ;;  %v4007_v12 = vshrl.u32 %v2575_v8, 7 }
 0x2dd   :  { %1337 = vadd.xlane.f32.xlu0 %v1336_v13 }
 0x2df   :  { %v1598_v20 = vpop.permute.xlu1 %1597 }
 0x2e2   :  { %v3907_v14 = vpop.eup %3541 }
 0x2e3   :  { %v3909_v15 = vpop.eup %3543  ;;  %v1339_v16 = vsel %vm651_vm2, %v3907_v14, 0.0  ;;  %v1750_v21 = vpop.permute.xlu1 %1749 }
 0x2e4   :  { %v1342_v17 = vsel %vm651_vm2, %v3909_v15, 0.0  ;;  %1340 = vadd.xlane.f32.xlu1 %v1339_v16 }
 0x2e5   :  { %1343 = vadd.xlane.f32.xlu0 %v1342_v17 }
 0x2f5   :  { %1901 = vrot.lane.b32.xlu1 %v3815_v54, %s3621_s2 }
 0x2fb   :  { %1825 = vrot.lane.b32.xlu0 %v3813_v51, %s3621_s2 }
 0x359   :  { %v1323_v23 = vpop.xlane.xlu1 %1322 }
 0x35a   :  { %3545 = vrcp.f32 %v1323_v23 }
 0x35d   :  { %v1326_v24 = vpop.xlane.xlu0 %1325 }
 0x35e   :  { %3547 = vrcp.f32 %v1326_v24 }
 0x361   :  { %v1329_v25 = vpop.xlane.xlu1 %1328 }
 0x362   :  { %3549 = vrcp.f32 %v1329_v25 }
 0x364   :  { %v3546_v26 = vpop.eup %3545 }
 0x365   :  { %v1353_v28 = vmul.f32 %v3546_v26, %v3530_v49  ;;  %v1332_v29 = vpop.xlane.xlu0 %1331 }
 0x366   :  { %3551 = vrcp.f32 %v1332_v29 }
 0x367   :  { %1361 = vst.msk [vmem:[#allocation4] sm:$0xff] %vm651_vm2, %v1353_v28  ;;  %3323 = vmatmul.mubr.msk.f32.vlgmr.msra.gmra.mrb[16].mxu0 %vm651_vm2, %v1353_v28 }
 0x368   :  { %v3548_v54 = vpop.eup %3547  ;;  %3331 = vmatpush3.msra.mxu0 %v1522_v19  ;;  %3332 = vmatprep.mubr.msk.f32.mxu0 %vm3618_vm0, %v3619_v11  ;;  %v2577_v19 = vsub.s32 0, %v4007_v12 }
 0x369   :  { %v1354_v51 = vmul.f32 %v3548_v54, %v3532_v56  ;;  %v1335_v30 = vpop.xlane.xlu1 %1334  ;;  %3340 = vmatprep.subr.mxu0 %v3619_v11 }
 0x36a   :  { %v1338_v32 = vpop.xlane.xlu0 %1337  ;;  %3553 = vrcp.f32 %v1335_v30 }
 0x36b   :  { %1362 = vst.msk [vmem:[#allocation4 + $0x8] sm:$0xff] %vm651_vm2, %v1354_v51  ;;  %3555 = vrcp.f32 %v1338_v32  ;;  %3328 = vmatmul.mubr.msk.f32.vlgmr.msra.gmra.mrb[16].mxu1 %vm651_vm2, %v1354_v51 }
 0x36c   :  { %v3550_v33 = vpop.eup %3549  ;;  %3336 = vmatpush3.msra.mxu1 %v1598_v20  ;;  %3337 = vmatprep.mubr.msk.f32.mxu1 %vm3618_vm0, %v3619_v11 }
 0x36d   :  { %v1355_v34 = vmul.f32 %v3550_v33, %v3889_v60  ;;  %3345 = vmatprep.subr.mxu1 %v3619_v11 }
 0x36f   :  { %1363 = vst.msk [vmem:[#allocation4 + $0x10] sm:$0xff] %vm651_vm2, %v1355_v34  ;;  %3333 = vmatmul.mubr.msk.f32.vlgmr.msra.gmra.mrb[18].mxu0 %vm651_vm2, %v1355_v34 }
 0x370   :  { %v3552_v36 = vpop.eup %3551  ;;  %3341 = vmatpush3.msra.mxu0 %v1674_v22  ;;  %3342 = vmatprep.mubr.msk.f32.mxu0 %vm3618_vm0, %v3619_v11  ;;  %v4016_v22 = vld [vmem:[%s4137_s6] sm:$0x3f] }
 0x371   :  { %v1356_v37 = vmul.f32 %v3552_v36, %v3893_v2  ;;  %v1341_v38 = vpop.xlane.xlu1 %1340  ;;  %3350 = vmatprep.subr.mxu0 %v3619_v11  ;;  %v2578_v25 = vrot.slane %v4016_v22, %v2577_v19 }
 0x372   :  { %v1344_v40 = vpop.xlane.xlu0 %1343  ;;  %3557 = vrcp.f32 %v1341_v38 }
 0x373   :  { %1364 = vst.msk [vmem:[#allocation4 + $0x18] sm:$0xff] %vm651_vm2, %v1356_v37  ;;  %3559 = vrcp.f32 %v1344_v40  ;;  %3338 = vmatmul.mubr.msk.f32.vlgmr.msra.gmra.mrb[18].mxu1 %vm651_vm2, %v1356_v37 }
 0x374   :  { %v3554_v41 = vpop.eup %3553  ;;  %3346 = vmatpush3.msra.mxu1 %v1750_v21  ;;  %3347 = vmatprep.mubr.msk.f32.mxu1 %vm3618_vm0, %v3619_v11 }
 0x375   :  { %v3556_v42 = vpop.eup %3555  ;;  %v1357_v31 = vmul.f32 %v3554_v41, %v3898_v9  ;;  %3355 = vmatprep.subr.mxu1 %v3619_v11  ;;  %v1902_v46 = vpop.permute.xlu1 %1901 }
 0x376   :  { %v1358_v44 = vmul.f32 %v3556_v42, %v3901_v10  ;;  %v1826_v39 = vpop.permute.xlu0 %1825 }
 0x377   :  { %1365 = vst.msk [vmem:[#allocation4 + $0x20] sm:$0xff] %vm651_vm2, %v1357_v31  ;;  %3343 = vmatmul.mubr.msk.f32.vlgmr.msra.gmra.mrb[20].mxu0 %vm651_vm2, %v1357_v31 }
 0x378   :  { %1366 = vst.msk [vmem:[#allocation4 + $0x28] sm:$0xff] %vm651_vm2, %v1358_v44  ;;  %3348 = vmatmul.mubr.msk.f32.vlgmr.msra.gmra.mrb[20].mxu1 %vm651_vm2, %v1358_v44  ;;  %3351 = vmatpush3.msra.mxu0 %v1826_v39 }
 0x379   :  { %3356 = vmatpush3.msra.mxu1 %v1902_v46  ;;  %3352 = vmatprep.mubr.msk.f32.mxu0 %vm3618_vm0, %v3619_v11 }
 0x37a   :  { %3357 = vmatprep.mubr.msk.f32.mxu1 %vm3618_vm0, %v3619_v11  ;;  %3360 = vmatprep.subr.mxu0 %v3619_v11 }
 0x37b   :  { %3365 = vmatprep.subr.mxu1 %v3619_v11 }
 0x37c   :  { %v3558_v35 = vpop.eup %3557 }
 0x37d   :  { %v3560_v47 = vpop.eup %3559  ;;  %v1359_v43 = vmul.f32 %v3558_v35, %v3907_v14 }
 0x37e   :  { %v1360_v49 = vmul.f32 %v3560_v47, %v3909_v15 }
 0x37f   :  { %1367 = vst.msk [vmem:[#allocation4 + $0x30] sm:$0xff] %vm651_vm2, %v1359_v43  ;;  %3353 = vmatmul.mubr.msk.f32.vlgmr.msra.gmra.mrb[22].mxu0 %vm651_vm2, %v1359_v43 }
 0x380   :  { %1368 = vst.msk [vmem:[#allocation4 + $0x38] sm:$0xff] %vm651_vm2, %v1360_v49  ;;  %3358 = vmatmul.mubr.msk.f32.vlgmr.msra.gmra.mrb[22].mxu1 %vm651_vm2, %v1360_v49  ;;  %3362 = vmatprep.mubr.msk.f32.mxu0 %vm3618_vm0, %v3619_v11 }
 0x381   :  { %3367 = vmatprep.mubr.msk.f32.mxu1 %vm3618_vm0, %v3619_v11  ;;  %3361 = vmatpush3.msra.mxu0 %v53_v50 }
 0x382   :  { %3370 = vmatprep.subr.mxu0 %v3619_v11  ;;  %3366 = vmatpush3.msra.mxu1 %v54_v45 }
 0x383   :  { %3375 = vmatprep.subr.mxu1 %v3619_v11 }
 0x43a   :  { %v1441_v48 = vpop.f32.mrb[16].mxu0 }
 0x43b   :  { %v3324_v53 = vpop.f32.mrb[17].mxu0  ;;  %3363 = vmatmul.mubr.msk.f32.vlgmr.msra.gmra.mrb[24].mxu0 %vm651_vm2, %v1441_v48 }
 0x43c   :  { %3371 = vmatpush3.msra.mxu0 %v55_v52  ;;  %3372 = vmatprep.mubr.msk.f32.mxu0 %vm3618_vm0, %v3619_v11 }
 0x43d   :  { %3380 = vmatprep.subr.mxu0 %v3619_v11 }
 0x43e   :  { %v1517_v56 = vpop.f32.mrb[16].mxu1 }
 0x43f   :  { %v3329_v57 = vpop.f32.mrb[17].mxu1  ;;  %3368 = vmatmul.mubr.msk.f32.vlgmr.msra.gmra.mrb[24].mxu1 %vm651_vm2, %v1517_v56 }
 0x440   :  { %3376 = vmatpush3.msra.mxu1 %v56_v55  ;;  %3377 = vmatprep.mubr.msk.f32.mxu1 %vm3618_vm0, %v3619_v11 }
 0x441   :  { %3385 = vmatprep.subr.mxu1 %v3619_v11 }
 0x442   :  { %v1593_v58 = vpop.f32.mrb[18].mxu0 }
 0x443   :  { %v3334_v59 = vpop.f32.mrb[19].mxu0  ;;  %3373 = vmatmul.mubr.msk.f32.vlgmr.msra.gmra.mrb[26].mxu0 %vm651_vm2, %v1593_v58 }
 0x444   :  { %3381 = vmatpush3.msra.mxu0 %v53_v50  ;;  %3382 = vmatprep.mubr.msk.f32.mxu0 %vm3618_vm0, %v3619_v11 }
 0x445   :  { %3390 = vmatprep.subr.mxu0 %v3619_v11 }
 0x446   :  { %v1669_v60 = vpop.f32.mrb[18].mxu1 }
 0x447   :  { %v3339_v61 = vpop.f32.mrb[19].mxu1  ;;  %3378 = vmatmul.mubr.msk.f32.vlgmr.msra.gmra.mrb[26].mxu1 %vm651_vm2, %v1669_v60  ;;  %v2623_v60 = vld [vmem:[%s4135_s4 + $0x8] sm:$0xff] }
 0x448   :  { %3386 = vmatpush3.msra.mxu1 %v54_v45  ;;  %3387 = vmatprep.mubr.msk.f32.mxu1 %vm3618_vm0, %v3619_v11 }
 0x449   :  { %3395 = vmatprep.subr.mxu1 %v3619_v11 }
 0x44a   :  { %v1745_v62 = vpop.f32.mrb[20].mxu0 }
 0x44b   :  { %v1821_v63 = vpop.f32.mrb[20].mxu1  ;;  %v3344_v0 = vpop.f32.mrb[21].mxu0  ;;  %3383 = vmatmul.mubr.msk.f32.vlgmr.msra.gmra.mrb[28].mxu0 %vm651_vm2, %v1745_v62  ;;  %v2624_v62 = vld [vmem:[%s4135_s4 + $0x10] sm:$0xff] }
 0x44c   :  { %v3349_v1 = vpop.f32.mrb[21].mxu1  ;;  %3388 = vmatmul.mubr.msk.f32.vlgmr.msra.gmra.mrb[28].mxu1 %vm651_vm2, %v1821_v63  ;;  %3391 = vmatpush3.msra.mxu0 %v55_v52  ;;  %v2625_v63 = vld [vmem:[%s4135_s4 + $0x18] sm:$0xff] }
 0x44d   :  { %3392 = vmatprep.mubr.msk.f32.mxu0 %vm3618_vm0, %v3619_v11  ;;  %3396 = vmatpush3.msra.mxu1 %v56_v55  ;;  %v3496_v0 = vpack.c.bf16 %v2625_v63, %v2624_v62 }
 0x44e   :  { %3397 = vmatprep.mubr.msk.f32.mxu1 %vm3618_vm0, %v3619_v11  ;;  %3492 = vmatprep.subr.bf16.mxu0 %v3617_v3 }
 0x44f   :  { %3498 = vmatprep.subr.bf16.mxu1 %v3617_v3 }
 0x452   :  { %v1897_v2 = vpop.f32.mrb[22].mxu0 }
 0x453   :  { %v1973_v4 = vpop.f32.mrb[22].mxu1  ;;  %v3354_v5 = vpop.f32.mrb[23].mxu0  ;;  %3393 = vmatmul.mubr.msk.f32.vlgmr.msra.gmra.mrb[30].mxu0 %vm651_vm2, %v1897_v2 }
 0x454   :  { %v3359_v6 = vpop.f32.mrb[23].mxu1  ;;  %3398 = vmatmul.mubr.msk.f32.vlgmr.msra.gmra.mrb[30].mxu1 %vm651_vm2, %v1973_v4  ;;  %3408 = vmatprep.mubr.msk.f32.mxu0 %vm3618_vm0, %v3619_v11  ;;  %v2612_v5 = vsub.s32 1, %v4007_v12 }
 0x455   :  { %3419 = vmatprep.mubr.msk.f32.mxu1 %vm3618_vm0, %v3619_v11  ;;  %v2618_v6 = vsub.s32 2, %v4007_v12 }
 0x456   :  { %v2613_v8 = vrot.slane %v4016_v22, %v2612_v5 }
 0x50e   :  { %v2046_v7 = vpop.f32.mrb[24].mxu0 }
 0x50f   :  { %v3364_v9 = vpop.f32.mrb[25].mxu0  ;;  %v2561_v13 = vsel %vm81_vm1, %v2046_v7, 0.0 }
 0x512   :  { %v2119_v10 = vpop.f32.mrb[24].mxu1 }
 0x513   :  { %v2562_v14 = vsel %vm81_vm1, %v2119_v10, 0.0  ;;  %v3369_v15 = vpop.f32.mrb[25].mxu1 }
 0x514   :  { %v2563_v16 = vadd.f32 %v2562_v14, %v2561_v13  ;;  %v2619_v14 = vrot.slane %v4016_v22, %v2618_v6  ;;  %v3067_v15 = vld [vmem:[%s4135_s4 + $0x20] sm:$0xff] }
 0x516   :  { %v2192_v17 = vpop.f32.mrb[26].mxu0 }
 0x517   :  { %v2564_v20 = vsel %vm81_vm1, %v2192_v17, 0.0  ;;  %v3374_v21 = vpop.f32.mrb[27].mxu0 }
 0x518   :  { %v2565_v23 = vadd.f32 %v2564_v20, %v2563_v16  ;;  %v3068_v16 = vld [vmem:[%s4135_s4 + $0x28] sm:$0xff] }
 0x519   :  { %v3505_v20 = vpack.c.bf16 %v3068_v16, %v3067_v15 }
 0x51a   :  { %v2265_v24 = vpop.f32.mrb[26].mxu1 }
 0x51b   :  { %v2566_v26 = vsel %vm81_vm1, %v2265_v24, 0.0  ;;  %v3379_v28 = vpop.f32.mrb[27].mxu1  ;;  %v3069_v24 = vld [vmem:[%s4135_s4 + $0x30] sm:$0xff] }
 0x51c   :  { %v2567_v29 = vadd.f32 %v2566_v26, %v2565_v23 }
 0x51e   :  { %v2579_v54 = vadd.f32 %v2578_v25, %v2567_v29  ;;  %v2338_v51 = vpop.f32.mrb[28].mxu0 }
 0x51f   :  { %v2568_v30 = vsel %vm81_vm1, %v2338_v51, 0.0  ;;  %v2411_v32 = vpop.f32.mrb[28].mxu1  ;;  %v3384_v33 = vpop.f32.mrb[29].mxu0 }
 0x520   :  { %v2569_v34 = vsel %vm81_vm1, %v2411_v32, 0.0  ;;  %v3389_v36 = vpop.f32.mrb[29].mxu1  ;;  %v2581_v37 = vadd.f32 %v2579_v54, %v3718_v18 }
 0x521   :  { %v2570_v38 = vadd.f32 %v2569_v34, %v2568_v30  ;;  %v3071_v30 = vld [vmem:[%s4136_s5] ss:$0 sm:$0xff]  ;;  %s3622_s5 = smov [#allocation4]  }
 0x522   :  { %v2583_v40 = vsel %vm81_vm1, %v2581_v37, 0.0  ;;  %s3008_s26 = sshll.u32 %s3622_s5, 4  ;;  %s3009_s26 = int_to_ptr.vmem [resolvable:$true] %s3008_s26 }
 0x523   :  { %2584 = vadd.xlane.f32.xlu0 %v2583_v40  ;;  %s3569_s27 = scalar_lea.vmem %s3009_s26, 1024  ;;  %p3574_p1 = scmp.lt.s32.totalorder %s3009_s26, %s3009_s26 }
 0x524   :  { %p3570_p0 = scmp.ne.s32.totalorder %s3009_s26, %s3569_s27  ;;  %p3575_p2 = scmp.lt.s32.totalorder %s3569_s27, %s3569_s27 }
 0x526   :  { %v2484_v41 = vpop.f32.mrb[30].mxu0  ;;  %p3576_p3 = por %p3575_p2, %p3574_p1 }
 0x527   :  { %v2571_v42 = vsel %vm81_vm1, %v2484_v41, 0.0  ;;  %v2557_v31 = vpop.f32.mrb[30].mxu1  ;;  %v3394_v44 = vpop.f32.mrb[31].mxu0 }
 0x528   :  { %v2572_v39 = vadd.f32 %v2571_v42, %v2570_v38  ;;  %v3399_v46 = vpop.f32.mrb[31].mxu1  ;;  %v2573_v35 = vsel %vm81_vm1, %v2557_v31, 0.0  ;;  %p3577_p4 = pnand %p3576_p3, %p3570_p0 }
 0x52a   :  { %v2574_v47 = vadd.f32 %v2573_v35, %v2572_v39 }
 0x52c   :  { %v2580_v43 = vadd.f32 %v2578_v25, %v2574_v47  ;;  %v3070_v25 = vld [vmem:[%s4135_s4 + $0x38] sm:$0xff] }
 0x52d   :  { %v3509_v26 = vpack.c.bf16 %v3070_v25, %v3069_v24 }
 0x52e   :  { %v2582_v49 = vadd.f32 %v2580_v43, %v3759_v27  ;;  %v2622_v27 = vld [vmem:[%s4135_s4] sm:$0xff] }
 0x52f   :  { %v3493_v61 = vpack.c.bf16 %v2623_v60, %v2622_v27 }
 0x530   :  { %v2586_v50 = vsel %vm81_vm1, %v2582_v49, 0.0 }
 0x531   :  { %2587 = vadd.xlane.f32.xlu1 %v2586_v50  ;;  %3494 = vmatpush3.bf16.msra.mxu0 %v3493_v61 }
 0x532   :  { %3500 = vmatpush3.bf16.msra.mxu1 %v3493_v61  ;;  %3495 = vmatprep.subr.bf16.mxu0 %v3617_v3 }
 0x533   :  { %3501 = vmatprep.subr.bf16.mxu1 %v3617_v3 }
 0x535   :  { %3497 = vmatpush3.bf16.msra.mxu0 %v3496_v0 }
 0x536   :  { %3503 = vmatpush3.bf16.msra.mxu1 %v3496_v0  ;;  %3504 = vmatprep.subr.bf16.mxu0 %v3617_v3 }
 0x537   :  { %3512 = vmatprep.subr.bf16.mxu1 %v3617_v3 }
 0x5b0   :  { %v2585_v18 = vpop.xlane.xlu0 %2584 }
 0x5b1   :  { %v2590_v45 = vmul.f32 0.03125, %v2585_v18 }
 0x5b3   :  { %v2592_v52 = vsub.f32 %v2581_v37, %v2590_v45 }
 0x5b5   :  { %v2594_v48 = vmul.f32 %v2592_v52, %v2592_v52 }
 0x5b7   :  { %v2596_v53 = vsel %vm81_vm1, %v2594_v48, 0.0 }
 0x5b8   :  { %2597 = vadd.xlane.f32.xlu0 %v2596_v53 }
 0x5be   :  { %v2588_v55 = vpop.xlane.xlu1 %2587 }
 0x5bf   :  { %v2591_v56 = vmul.f32 0.03125, %v2588_v55 }
 0x5c1   :  { %v2593_v57 = vsub.f32 %v2582_v49, %v2591_v56 }
 0x5c3   :  { %v2595_v58 = vmul.f32 %v2593_v57, %v2593_v57 }
 0x5c5   :  { %v2599_v59 = vsel %vm81_vm1, %v2595_v58, 0.0 }
 0x5c6   :  { %2600 = vadd.xlane.f32.xlu0 %v2599_v59 }
 0x645   :  { %v2598_v1 = vpop.xlane.xlu0 %2597 }
 0x646   :  { %v2602_v2 = vmul.f32 0.03125, %v2598_v1 }
 0x648   :  { %v2604_v4 = vadd.f32 1e-05, %v2602_v2 }
 0x64a   :  { %3561 = vrsqrt.f32 %v2604_v4 }
 0x653   :  { %v2601_v7 = vpop.xlane.xlu0 %2600 }
 0x654   :  { %v3562_v9 = vpop.eup %3561  ;;  %v2603_v10 = vmul.f32 0.03125, %v2601_v7 }
 0x655   :  { %v2608_v13 = vmul.f32 %v3562_v9, %v2592_v52 }
 0x656   :  { %v2605_v17 = vadd.f32 1e-05, %v2603_v10 }
 0x657   :  { %v2614_v19 = vmul.f32 %v2613_v8, %v2608_v13 }
 0x658   :  { %3563 = vrsqrt.f32 %v2605_v17 }
 0x659   :  { %v2620_v21 = vadd.f32 %v2619_v14, %v2614_v19 }
 0x65b   :  { %3409 = vmatmul.mubr.msk.f32.vlgmr.msra.gmra.mrb[32].mxu0 %vm81_vm1, %v2620_v21 }
 0x65c   :  { %3507 = vmatpush3.bf16.xpose.msk.msra.mxu0 %vm4058_vm4, %v3505_v20  ;;  %3430 = vmatprep.mubr.msk.f32.mxu0 %vm3618_vm0, %v3619_v11 }
 0x65d   :  { %3508 = vmatprep.subr.bf16.mxu0 %v3617_v3 }
 0x662   :  { %v3564_v28 = vpop.eup %3563 }
 0x663   :  { %v2609_v29 = vmul.f32 %v3564_v28, %v2593_v57 }
 0x664   :  { %3511 = vmatpush3.bf16.xpose.msk.msra.mxu0 %vm4058_vm4, %v3509_v26 }
 0x665   :  { %v2615_v54 = vmul.f32 %v2613_v8, %v2609_v29 }
 0x667   :  { %v2621_v51 = vadd.f32 %v2619_v14, %v2615_v54 }
 0x669   :  { %3420 = vmatmul.mubr.msk.f32.vlgmr.msra.gmra.mrb[32].mxu1 %vm81_vm1, %v2621_v51 }
 0x66a   :  { %3515 = vmatpush3.bf16.xpose.msk.msra.mxu1 %vm4058_vm4, %v3505_v20  ;;  %3441 = vmatprep.mubr.msk.f32.mxu1 %vm3618_vm0, %v3619_v11 }
 0x66b   :  { %3516 = vmatprep.subr.bf16.mxu1 %v3617_v3  ;;  %v2788_v3 = vsub.s32 3, %v4007_v12 }
 0x66d   :  { %v2789_v11 = vrot.slane %v4016_v22, %v2788_v3 }
 0x672   :  { %3519 = vmatpush3.bf16.xpose.msk.msra.mxu1 %vm4058_vm4, %v3509_v26 }
 0x72e   :  { %v2707_v32 = vpop.f32.mrb[32].mxu0 }
 0x72f   :  { %v2708_v33 = vadd.f32 %v3071_v30, %v2707_v32  ;;  %v3410_v34 = vpop.f32.mrb[33].mxu0 }
 0x731   :  { %v2784_v36 = vmax.f32 %v2708_v33, 0.0 }
 0x733   :  { %3431 = vmatmul.mubr.msk.f32.vlgmr.msra.gmra.mrb[34].mxu0 %vm2790_vm3, %v2784_v36 }
 0x73c   :  { %v2780_v37 = vpop.f32.mrb[32].mxu1 }
 0x73d   :  { %v2781_v38 = vadd.f32 %v3071_v30, %v2780_v37  ;;  %v3421_v40 = vpop.f32.mrb[33].mxu1 }
 0x73f   :  { %v2785_v41 = vmax.f32 %v2781_v38, 0.0 }
 0x741   :  { %3442 = vmatmul.mubr.msk.f32.vlgmr.msra.gmra.mrb[34].mxu1 %vm2790_vm3, %v2785_v41 }
 0x806   :  { %v2872_v42 = vpop.f32.mrb[34].mxu0 }
 0x807   :  { %v2873_v31 = vadd.f32 %v2872_v42, %v2789_v11  ;;  %v3432_v44 = vpop.f32.mrb[35].mxu0 }
 0x809   :  { %v2949_v39 = vadd.f32 %v2873_v31, %v2620_v21 }
 0x80b   :  { %v2951_v46 = vsel %vm81_vm1, %v2949_v39, 0.0 }
 0x80c   :  { %2952 = vadd.xlane.f32.xlu1 %v2951_v46 }
 0x814   :  { %v2945_v35 = vpop.f32.mrb[34].mxu1 }
 0x815   :  { %v2946_v47 = vadd.f32 %v2945_v35, %v2789_v11  ;;  %v3443_v43 = vpop.f32.mrb[35].mxu1 }
 0x817   :  { %v2950_v49 = vadd.f32 %v2946_v47, %v2621_v51 }
 0x819   :  { %v2954_v50 = vsel %vm81_vm1, %v2950_v49, 0.0 }
 0x81a   :  { %2955 = vadd.xlane.f32.xlu0 %v2954_v50 }
 0x899   :  { %v2953_v18 = vpop.xlane.xlu1 %2952 }
 0x89a   :  { %v2957_v45 = vmul.f32 0.03125, %v2953_v18 }
 0x89c   :  { %v2959_v52 = vsub.f32 %v2949_v39, %v2957_v45 }
 0x89e   :  { %v2961_v48 = vmul.f32 %v2959_v52, %v2959_v52 }
 0x8a0   :  { %v2963_v53 = vsel %vm81_vm1, %v2961_v48, 0.0 }
 0x8a1   :  { %2964 = vadd.xlane.f32.xlu1 %v2963_v53 }
 0x8a7   :  { %v2956_v55 = vpop.xlane.xlu0 %2955 }
 0x8a8   :  { %v2958_v56 = vmul.f32 0.03125, %v2956_v55 }
 0x8aa   :  { %v2960_v57 = vsub.f32 %v2950_v49, %v2958_v56 }
 0x8ac   :  { %v2962_v58 = vmul.f32 %v2960_v57, %v2960_v57 }
 0x8ae   :  { %v2966_v59 = vsel %vm81_vm1, %v2962_v58, 0.0 }
 0x8af   :  { %2967 = vadd.xlane.f32.xlu0 %v2966_v59 }
 0x8b0   :  { %3580 = shalt.err (!%p3577_p4)
}
 0x8b1   :  { %s3581_s30 = scalar_lea.hbm %s4139_s8, 1024 }
 0x8b2   :  { %p3582_p5 = scmp.ne.s32.totalorder %s4139_s8, %s3581_s30  ;;  %p3585_p6 = scmp.lt.u32.totalorder %s3581_s30, %s4139_s8 }
 0x8b4   :  { %p3587_p7 = pnand %p3585_p6, %p3582_p5 }
 0x8b6   :  { %3590 = shalt.err (!%p3587_p7)
}
 0x8b7   :  { %s3623_s12 = smov 128   ;;  %s3624_s6 = smov 8   ;;  %v2979_v62 = vsub.s32 4, %v4007_v12  ;;  %v2985_v63 = vsub.s32 5, %v4007_v12 }
 0x8b8   :  { %3014 = dma.vmem_to_hbm [thread:$0]  %s3009_s26, 1024, %s4139_s8, [#allocation5], %s3623_s12, %s3623_s12, %s3624_s6  }
 0x8b9   :  { %v2980_v1 = vrot.slane %v4016_v22, %v2979_v62  ;;  %v2986_v6 = vrot.slane %v4016_v22, %v2985_v63  ;;  %s3625_s8 = smov [#allocation2]  }
 0x8ba   :  { %s2996_s15 = sshll.u32 %s3625_s8, 4  ;;  %s2997_s15 = int_to_ptr.vmem [resolvable:$true] %s2996_s15 }
 0x8bb   :  { %s3591_s16 = scalar_lea.vmem %s2997_s15, 256  ;;  %p3596_p9 = scmp.lt.s32.totalorder %s2997_s15, %s2997_s15 }
 0x8bc   :  { %p3592_p8 = scmp.ne.s32.totalorder %s2997_s15, %s3591_s16  ;;  %p3597_p10 = scmp.lt.s32.totalorder %s3591_s16, %s3591_s16 }
 0x8be   :  { %p3598_p11 = por %p3597_p10, %p3596_p9 }
 0x8c0   :  { %p3599_p12 = pnand %p3598_p11, %p3592_p8 }
 0x92e   :  { %v2965_v27 = vpop.xlane.xlu1 %2964 }
 0x92f   :  { %v2969_v60 = vmul.f32 0.03125, %v2965_v27 }
 0x931   :  { %v2971_v61 = vadd.f32 1e-05, %v2969_v60 }
 0x933   :  { %3565 = vrsqrt.f32 %v2971_v61 }
 0x93c   :  { %v2968_v0 = vpop.xlane.xlu0 %2967 }
 0x93d   :  { %v3566_v2 = vpop.eup %3565  ;;  %v2970_v4 = vmul.f32 0.03125, %v2968_v0 }
 0x93e   :  { %v2975_v5 = vmul.f32 %v3566_v2, %v2959_v52 }
 0x93f   :  { %v2972_v7 = vadd.f32 1e-05, %v2970_v4 }
 0x940   :  { %v2981_v8 = vmul.f32 %v2980_v1, %v2975_v5 }
 0x941   :  { %3567 = vrsqrt.f32 %v2972_v7 }
 0x942   :  { %v2987_v9 = vadd.f32 %v2986_v6, %v2981_v8 }
 0x944   :  { %2989 = vst.msk [vmem:[#allocation2] sm:$0xff] %vm81_vm1, %v2987_v9 }
 0x94b   :  { %v3568_v10 = vpop.eup %3567 }
 0x94c   :  { %v2976_v13 = vmul.f32 %v3568_v10, %v2960_v57 }
 0x94e   :  { %v2982_v14 = vmul.f32 %v2980_v1, %v2976_v13 }
 0x950   :  { %v2988_v12 = vadd.f32 %v2986_v6, %v2982_v14 }
 0x952   :  { %2990 = vst.msk [vmem:[#allocation2 + $0x8] sm:$0xff] %vm81_vm1, %v2988_v12 }
 0x953   :  { %3602 = shalt.err (!%p3599_p12)
}
 0x954   :  { %s3603_s0 = scalar_lea.hbm %s4138_s7, 256 }
 0x955   :  { %p3604_p13 = scmp.ne.s32.totalorder %s4138_s7, %s3603_s0  ;;  %p3607_p0 = scmp.lt.u32.totalorder %s3603_s0, %s4138_s7 }
 0x957   :  { %p3609_p1 = pnand %p3607_p0, %p3604_p13 }
 0x959   :  { %3612 = shalt.err (!%p3609_p1)
}
 0x95a   :  { %3002 = dma.vmem_to_hbm [thread:$0]  %s2997_s15, 256, %s4138_s7, [#allocation3], %s3623_s12, %s3623_s12, %s3624_s6  }
 0x95b   :  { %3613 = dma.done.wait [#allocation3], 256  }
 0x95c   :  { %3614 = vsyncadd [#allocation3], 4294967040 }
 0x95d   :  { %3615 = dma.done.wait [#allocation5], 1024  }
 0x95e   :  { %3616 = vsyncadd [#allocation5], 4294966272 }
 0x95f   :  { %3021 = vsyncpa [#allocation3], 1 }
 0x960   :  { %3022 = vsyncpa [#allocation5], 1 }

</bundles_post_ra>
